<compile_context>
chip_gen: v7x
topology: tpu7x:2x2x1
jax: 0.10.0
libtpu: 0.0.40
codegen_flags: <defaults>
</compile_context>

<pallas_src>
import functools
import math

import jax
import jax.numpy as jnp
from jax import lax
from jax.experimental import pallas as pl
from jax.experimental.pallas import tpu as pltpu


def divide_head(num_head, len_feature):
    if len_feature % num_head == 0:
        per = len_feature // num_head
        return [per] * num_head
    per = len_feature // num_head
    rest = len_feature - num_head * per
    ls = [per] * num_head
    ls[-1] += rest
    return ls


# ---------------------------------------------------------------------------
# Fused Pallas kernel: all heads + fusion projection in one pass.
# ---------------------------------------------------------------------------

def _fused_mha_kernel(x_ref, wq_ref, bq_ref, wkv_ref, bkv_ref,
                      wfu_ref, bfu_ref, o_ref, kv_ref, cat_ref,
                      *, partials, feat, tq):
    """Grid step (b, qi): query tile (tq, F) -> output tile (tq, F_pad)."""
    qi = pl.program_id(1)
    F = feat
    T = x_ref.shape[1]

    # --- K/V projection over the full sequence, once per batch element -----
    @pl.when(qi == 0)
    def _():
        x_full = x_ref[0].astype(jnp.bfloat16)                      # (T, F)
        kv = jnp.dot(x_full, wkv_ref[...],
                     preferred_element_type=jnp.float32) + bkv_ref[...]
        kv_ref[...] = kv.astype(jnp.bfloat16)                       # (T, 2F) bf16

    # --- Q projection for this query tile (1/sqrt(d) baked into wq/bq) -----
    if tq == T:
        x_q = x_ref[0]
    else:
        q_start = pl.multiple_of(qi * tq, tq)
        x_q = x_ref[0, pl.ds(q_start, tq), :]
    q = (jnp.dot(x_q.astype(jnp.bfloat16), wq_ref[...],
                 preferred_element_type=jnp.float32)
         + bq_ref[...]).astype(jnp.bfloat16)                        # (tq, F) bf16

    # --- per-head attention; each head writes straight into cat_ref --------
    start = 0
    for d in partials:                          # static loop, scratch-bounded
        q_h = q[:, start:start + d]                                 # (tq, d) bf16
        k_h = kv_ref[:, start:start + d]                            # (T, d) bf16
        v_h = kv_ref[:, F + start:F + start + d]                    # (T, d) bf16

        # contract both on last dim -> no explicit transpose of k
        s = lax.dot_general(q_h, k_h, (((1,), (1,)), ((), ())),
                            preferred_element_type=jnp.float32)     # (tq, T) f32
        m = jnp.max(s, axis=-1, keepdims=True)
        p = jnp.exp(s - m)                                          # unnormalized
        l = jnp.sum(p, axis=-1, keepdims=True)
        o_h = jnp.dot(p.astype(jnp.bfloat16), v_h,
                      preferred_element_type=jnp.float32)           # (tq, d)
        cat_ref[:, start:start + d] = o_h * pl.reciprocal(l, approx=True)
        start += d

    # --- fusion projection (output is 128-lane padded -> dense stores) -----
    fused = jnp.dot(cat_ref[...].astype(jnp.bfloat16), wfu_ref[...],
                    preferred_element_type=jnp.float32) + bfu_ref[...]
    o_ref[0] = fused.astype(o_ref.dtype)


# ---------------------------------------------------------------------------
# Wrapper around pallas_call
# ---------------------------------------------------------------------------

def _choose_q_tile(T):
    for cand in (512, 256, 128):
        if T % cand == 0:
            return cand
    return T


def _vmem_limit_bytes(T, F, F_pad, tq):
    x_blk = 2 * T * F * 4                                  # double-buffered input
    out_blk = 2 * tq * F_pad * 4                           # double-buffered output
    weights = 2 * ((F * F + F * 2 * F + F * F_pad) * 2
                   + (F + 2 * F + F_pad) * 4)
    scratch = T * 2 * F * 2 + tq * F * 4
    interm = T * 3 * F * 4 + 2 * tq * T * 4 + 2 * tq * F_pad * 4 + tq * F * 4
    total = x_blk + out_blk + weights + scratch + interm
    return int(min(96 * 1024 * 1024, max(32 * 1024 * 1024, 2 * total)))


def multi_head_attention_forward(packed, x):
    """x: (B, T, F) f32 -> (B, T, F_out) f32 in a single pallas_call."""
    B, T, F = x.shape
    F_out = packed["f_out"]
    F_pad = packed["w_fusion"].shape[1]
    tq = _choose_q_tile(T)
    nq = T // tq

    kernel = functools.partial(_fused_mha_kernel,
                               partials=tuple(packed["partials"]),
                               feat=F, tq=tq)

    out = pl.pallas_call(
        kernel,
        out_shape=jax.ShapeDtypeStruct((B, T, F_pad), jnp.float32),
        grid_spec=pltpu.PrefetchScalarGridSpec(
            num_scalar_prefetch=0,
            grid=(B, nq),
            in_specs=[
                pl.BlockSpec((1, T, F), lambda b, q: (b, 0, 0)),       # x
                pl.BlockSpec((F, F), lambda b, q: (0, 0)),             # wq (scaled)
                pl.BlockSpec((1, F), lambda b, q: (0, 0)),             # bq (scaled)
                pl.BlockSpec((F, 2 * F), lambda b, q: (0, 0)),         # wkv
                pl.BlockSpec((1, 2 * F), lambda b, q: (0, 0)),         # bkv
                pl.BlockSpec((F, F_pad), lambda b, q: (0, 0)),         # w_fusion
                pl.BlockSpec((1, F_pad), lambda b, q: (0, 0)),         # b_fusion
            ],
            out_specs=pl.BlockSpec((1, tq, F_pad), lambda b, q: (b, q, 0)),
            scratch_shapes=[
                pltpu.VMEM((T, 2 * F), jnp.bfloat16),   # K|V for current batch elem
                pltpu.VMEM((tq, F), jnp.float32),       # per-head concat buffer
            ],
        ),
        compiler_params=pltpu.CompilerParams(
            dimension_semantics=("parallel", "arbitrary"),
            vmem_limit_bytes=_vmem_limit_bytes(T, F, F_pad, tq),
        ),
    )(x, packed["wq"], packed["bq"], packed["wkv"], packed["bkv"],
      packed["w_fusion"], packed["b_fusion"])

    if F_pad != F_out:
        out = out[:, :, :F_out]
    return out


# ---------------------------------------------------------------------------
# Parameter init (per-head, mirrors the PyTorch module) + packing for the kernel
# ---------------------------------------------------------------------------

def init_params(key, num_head, len_feature_input, len_feature_new):
    partials = divide_head(num_head, len_feature_input)
    params = {"heads": [], "partials": partials}
    keys = jax.random.split(key, num_head * 6 + 2)
    ki = 0
    for d in partials:
        head = {}
        for name in ("wq", "wk", "wv"):
            head[name] = (jax.random.normal(keys[ki], (d, d), jnp.float32)
                          * (1.0 / math.sqrt(d)))
            ki += 1
            head["b" + name[1]] = (
                jax.random.normal(keys[ki], (1, d), jnp.float32) * 0.02)
            ki += 1
        params["heads"].append(head)
    params["w_fusion"] = (
        jax.random.normal(keys[ki], (len_feature_input, len_feature_new),
                          jnp.float32) * (1.0 / math.sqrt(len_feature_input)))
    ki += 1
    params["b_fusion"] = (
        jax.random.normal(keys[ki], (1, len_feature_new), jnp.float32) * 0.02)
    return params


def pack_params(params, len_feature_input):
    """Pack per-head weights for the fused kernel.

    - wq: block-diagonal (F, F) with 1/sqrt(d) baked into each head block.
    - wkv: [block-diag Wk | block-diag Wv] -> (F, 2F).
    - w_fusion/b_fusion: zero-padded on the output dim to a multiple of 128
      (lane-dense stores); padding sliced off in the wrapper.
    """
    F = len_feature_input
    partials = params["partials"]
    scales = [1.0 / math.sqrt(d) for d in partials]

    def blockdiag(name, scal=None):
        W = jnp.zeros((F, F), jnp.float32)
        start = 0
        for i, (head, d) in enumerate(zip(params["heads"], partials)):
            w = head[name] if scal is None else head[name] * scal[i]
            W = W.at[start:start + d, start:start + d].set(w)
            start += d
        return W

    wq = blockdiag("wq", scales)
    bq = jnp.concatenate(
        [h["bq"] * s for h, s in zip(params["heads"], scales)], axis=-1)
    wkv = jnp.concatenate([blockdiag("wk"), blockdiag("wv")], axis=1)
    bkv = jnp.concatenate(
        [jnp.concatenate([h["bk"] for h in params["heads"]], axis=-1),
         jnp.concatenate([h["bv"] for h in params["heads"]], axis=-1)], axis=-1)

    F_out = params["w_fusion"].shape[1]
    F_pad = 128 * pl.cdiv(F_out, 128)
    wfu = params["w_fusion"]
    bfu = params["b_fusion"]
    if F_pad != F_out:
        wfu = jnp.pad(wfu, ((0, 0), (0, F_pad - F_out)))
        bfu = jnp.pad(bfu, ((0, 0), (0, F_pad - F_out)))

    return {
        "partials": partials,
        "wq": wq.astype(jnp.bfloat16),
        "bq": bq,                                   # f32 (scale baked in)
        "wkv": wkv.astype(jnp.bfloat16),
        "bkv": bkv,                                 # f32
        "w_fusion": wfu.astype(jnp.bfloat16),
        "b_fusion": bfu,                            # f32, padded
        "f_out": F_out,
    }


# ---------------------------------------------------------------------------
# Pure-JAX reference (f32) for a sanity check
# ---------------------------------------------------------------------------

def mha_reference(params, x):
    outs = []
    start = 0
    for head, d in zip(params["heads"], params["partials"]):
        xp = x[:, :, start:start + d]
        q = jnp.einsum("btd,de->bte", xp, head["wq"]) + head["bq"]
        k = jnp.einsum("btd,de->bte", xp, head["wk"]) + head["bk"]
        v = jnp.einsum("btd,de->bte", xp, head["wv"]) + head["bv"]
        s = jnp.einsum("btd,bsd->bts", q, k) / math.sqrt(d)
        p = jax.nn.softmax(s, axis=-1)
        outs.append(jnp.einsum("bts,bsd->btd", p, v))
        start += d
    cat = jnp.concatenate(outs, axis=-1)
    return jnp.einsum("btf,fg->btg", cat, params["w_fusion"]) + params["b_fusion"]


if __name__ == "__main__":
    B, T = 2, 8
    num_head = 4
    len_feature_input = 32   # divisible by num_head -> 8 features per head
    len_feature_new = 16

    key = jax.random.PRNGKey(0)
    key_x, key_p = jax.random.split(key)
    x = jax.random.normal(key_x, (B, T, len_feature_input), jnp.float32)
    params = init_params(key_p, num_head, len_feature_input, len_feature_new)
    packed = pack_params(params, len_feature_input)

    out = multi_head_attention_forward(packed, x)
    jax.block_until_ready(out)
    assert out.shape == (B, T, len_feature_new), out.shape

    ref = mha_reference(params, x)
    err = float(jnp.max(jnp.abs(out - ref)))
    assert err < 1e-1, f"max abs err {err}"  # bf16 MXU inputs + approx reciprocal

    print("KERNEL_OK")
</pallas_src>

<mosaic_0001>
module attributes {stable_mosaic.version = 11 : i64} {
  func.func @_fused_mha_kernel(%arg0: i32, %arg1: i32, %arg2: memref<1x8x32xf32, #tpu.memory_space<vmem>>, %arg3: memref<32x32xbf16, #tpu.memory_space<vmem>>, %arg4: memref<1x32xf32, #tpu.memory_space<vmem>>, %arg5: memref<32x64xbf16, #tpu.memory_space<vmem>>, %arg6: memref<1x64xf32, #tpu.memory_space<vmem>>, %arg7: memref<32x128xbf16, #tpu.memory_space<vmem>>, %arg8: memref<1x128xf32, #tpu.memory_space<vmem>>, %arg9: memref<1x8x128xf32, #tpu.memory_space<vmem>>, %arg10: memref<8x64xbf16, #tpu.memory_space<vmem>>, %arg11: memref<8x32xf32, #tpu.memory_space<vmem>>) attributes {dimension_semantics = [#tpu.dimension_semantics<parallel>, #tpu.dimension_semantics<arbitrary>], iteration_bounds = array<i64: 2, 1>, scalar_prefetch = 0 : i64, scratch_operands = 2 : i64, tpu.core_type = #tpu.core_type<tc>, window_params = [{transform_indices = @transform_0, window_bounds = array<i64: 1, 8, 32>}, {pipeline_mode = #tpu.pipeline_mode<synchronous>, transform_indices = @transform_1, window_bounds = array<i64: 32, 32>}, {pipeline_mode = #tpu.pipeline_mode<synchronous>, transform_indices = @transform_2, window_bounds = array<i64: 1, 32>}, {pipeline_mode = #tpu.pipeline_mode<synchronous>, transform_indices = @transform_3, window_bounds = array<i64: 32, 64>}, {pipeline_mode = #tpu.pipeline_mode<synchronous>, transform_indices = @transform_4, window_bounds = array<i64: 1, 64>}, {pipeline_mode = #tpu.pipeline_mode<synchronous>, transform_indices = @transform_5, window_bounds = array<i64: 32, 128>}, {pipeline_mode = #tpu.pipeline_mode<synchronous>, transform_indices = @transform_6, window_bounds = array<i64: 1, 128>}, {transform_indices = @transform_7, window_bounds = array<i64: 1, 8, 128>}]} {
    %c0_i32 = arith.constant 0 : i32
    %0 = arith.cmpi eq, %arg1, %c0_i32 : i32
    %1 = arith.extui %0 : i1 to i32
    %c0_i32_0 = arith.constant 0 : i32
    %2 = arith.cmpi ne, %1, %c0_i32_0 : i32
    scf.if %2 {
      %c0_50 = arith.constant 0 : index
      %c0_51 = arith.constant 0 : index
      %c0_52 = arith.constant 0 : index
      %90 = vector.load %arg2[%c0_50, %c0_51, %c0_52] : memref<1x8x32xf32, #tpu.memory_space<vmem>>, vector<1x8x32xf32>
      %91 = vector.shape_cast %90 : vector<1x8x32xf32> to vector<8x32xf32>
      %92 = arith.truncf %91 : vector<8x32xf32> to vector<8x32xbf16>
      %c0_53 = arith.constant 0 : index
      %c0_54 = arith.constant 0 : index
      %93 = vector.load %arg5[%c0_53, %c0_54] : memref<32x64xbf16, #tpu.memory_space<vmem>>, vector<32x64xbf16>
      %cst_55 = arith.constant dense<0.000000e+00> : vector<8x64xf32>
      %94 = tpu.matmul %92, %93, %cst_55 {dimension_numbers = #tpu.dot_dimension_numbers<[1], [0], [0], [1], [0, 0, 1, 1], [], []>} : vector<8x32xbf16>, vector<32x64xbf16>, vector<8x64xf32> -> vector<8x64xf32>
      %c0_56 = arith.constant 0 : index
      %c0_57 = arith.constant 0 : index
      %95 = vector.load %arg6[%c0_56, %c0_57] : memref<1x64xf32, #tpu.memory_space<vmem>>, vector<1x64xf32>
      %96 = vector.broadcast %95 : vector<1x64xf32> to vector<8x64xf32>
      %97 = arith.addf %94, %96 : vector<8x64xf32>
      %98 = arith.truncf %97 : vector<8x64xf32> to vector<8x64xbf16>
      %c0_58 = arith.constant 0 : index
      %c0_59 = arith.constant 0 : index
      %99 = vector.load %arg10[%c0_58, %c0_59] : memref<8x64xbf16, #tpu.memory_space<vmem>>, vector<8x64xbf16>
      tpu.vector_store %arg10[%c0_58, %c0_59], %98 {strides = array<i32>} : memref<8x64xbf16, #tpu.memory_space<vmem>>, vector<8x64xbf16>,
    } else {
    }
    %c0 = arith.constant 0 : index
    %c0_1 = arith.constant 0 : index
    %c0_2 = arith.constant 0 : index
    %3 = vector.load %arg2[%c0, %c0_1, %c0_2] : memref<1x8x32xf32, #tpu.memory_space<vmem>>, vector<1x8x32xf32>
    %4 = vector.shape_cast %3 : vector<1x8x32xf32> to vector<8x32xf32>
    %5 = arith.truncf %4 : vector<8x32xf32> to vector<8x32xbf16>
    %c0_3 = arith.constant 0 : index
    %c0_4 = arith.constant 0 : index
    %6 = vector.load %arg3[%c0_3, %c0_4] : memref<32x32xbf16, #tpu.memory_space<vmem>>, vector<32x32xbf16>
    %cst = arith.constant dense<0.000000e+00> : vector<8x32xf32>
    %7 = tpu.matmul %5, %6, %cst {dimension_numbers = #tpu.dot_dimension_numbers<[1], [0], [0], [1], [0, 0, 1, 1], [], []>} : vector<8x32xbf16>, vector<32x32xbf16>, vector<8x32xf32> -> vector<8x32xf32>
    %c0_5 = arith.constant 0 : index
    %c0_6 = arith.constant 0 : index
    %8 = vector.load %arg4[%c0_5, %c0_6] : memref<1x32xf32, #tpu.memory_space<vmem>>, vector<1x32xf32>
    %9 = vector.broadcast %8 : vector<1x32xf32> to vector<8x32xf32>
    %10 = arith.addf %7, %9 : vector<8x32xf32>
    %11 = arith.truncf %10 : vector<8x32xf32> to vector<8x32xbf16>
    %12 = vector.extract_strided_slice %11 {offsets = [0, 0], sizes = [8, 8], strides = [1, 1]} : vector<8x32xbf16> to vector<8x8xbf16>
    %c0_7 = arith.constant 0 : index
    %c0_8 = arith.constant 0 : index
    %13 = vector.load %arg10[%c0_7, %c0_8] : memref<8x64xbf16, #tpu.memory_space<vmem>>, vector<8x8xbf16>
    %c0_9 = arith.constant 0 : index
    %c32 = arith.constant 32 : index
    %14 = vector.load %arg10[%c0_9, %c32] : memref<8x64xbf16, #tpu.memory_space<vmem>>, vector<8x8xbf16>
    %cst_10 = arith.constant dense<0.000000e+00> : vector<8x8xf32>
    %15 = tpu.matmul %12, %13, %cst_10 {dimension_numbers = #tpu.dot_dimension_numbers<[1], [1], [0], [0], [0, 0, 1, 0], [], []>} : vector<8x8xbf16>, vector<8x8xbf16>, vector<8x8xf32> -> vector<8x8xf32>
    %cst_11 = arith.constant dense<0xFF800000> : vector<8xf32>
    %16 = vector.multi_reduction <maximumf>, %15, %cst_11 [1] : vector<8x8xf32> to vector<8xf32>
    %17 = vector.shape_cast %16 : vector<8xf32> to vector<8x1xf32>
    %18 = vector.broadcast %17 : vector<8x1xf32> to vector<8x8xf32>
    %19 = arith.subf %15, %18 : vector<8x8xf32>
    %20 = math.exp %19 : vector<8x8xf32>
    %cst_12 = arith.constant dense<0.000000e+00> : vector<8xf32>
    %21 = vector.multi_reduction <add>, %20, %cst_12 [1] : vector<8x8xf32> to vector<8xf32>
    %22 = vector.shape_cast %21 : vector<8xf32> to vector<8x1xf32>
    %23 = arith.truncf %20 : vector<8x8xf32> to vector<8x8xbf16>
    %cst_13 = arith.constant dense<0.000000e+00> : vector<8x8xf32>
    %24 = tpu.matmul %23, %14, %cst_13 {dimension_numbers = #tpu.dot_dimension_numbers<[1], [0], [0], [1], [0, 0, 1, 1], [], []>} : vector<8x8xbf16>, vector<8x8xbf16>, vector<8x8xf32> -> vector<8x8xf32>
    %25 = tpu.reciprocal %22 {approx = true} : vector<8x1xf32> -> vector<8x1xf32>
    %26 = vector.broadcast %25 : vector<8x1xf32> to vector<8x8xf32>
    %27 = arith.mulf %24, %26 : vector<8x8xf32>
    %c0_14 = arith.constant 0 : index
    %c0_15 = arith.constant 0 : index
    %28 = vector.load %arg11[%c0_14, %c0_15] : memref<8x32xf32, #tpu.memory_space<vmem>>, vector<8x8xf32>
    tpu.vector_store %arg11[%c0_14, %c0_15], %27 {strides = array<i32>} : memref<8x32xf32, #tpu.memory_space<vmem>>, vector<8x8xf32>,
    %29 = vector.extract_strided_slice %11 {offsets = [0, 8], sizes = [8, 8], strides = [1, 1]} : vector<8x32xbf16> to vector<8x8xbf16>
    %c0_16 = arith.constant 0 : index
    %c8 = arith.constant 8 : index
    %30 = vector.load %arg10[%c0_16, %c8] : memref<8x64xbf16, #tpu.memory_space<vmem>>, vector<8x8xbf16>
    %c0_17 = arith.constant 0 : index
    %c40 = arith.constant 40 : index
    %31 = vector.load %arg10[%c0_17, %c40] : memref<8x64xbf16, #tpu.memory_space<vmem>>, vector<8x8xbf16>
    %cst_18 = arith.constant dense<0.000000e+00> : vector<8x8xf32>
    %32 = tpu.matmul %29, %30, %cst_18 {dimension_numbers = #tpu.dot_dimension_numbers<[1], [1], [0], [0], [0, 0, 1, 0], [], []>} : vector<8x8xbf16>, vector<8x8xbf16>, vector<8x8xf32> -> vector<8x8xf32>
    %cst_19 = arith.constant dense<0xFF800000> : vector<8xf32>
    %33 = vector.multi_reduction <maximumf>, %32, %cst_19 [1] : vector<8x8xf32> to vector<8xf32>
    %34 = vector.shape_cast %33 : vector<8xf32> to vector<8x1xf32>
    %35 = vector.broadcast %34 : vector<8x1xf32> to vector<8x8xf32>
    %36 = arith.subf %32, %35 : vector<8x8xf32>
    %37 = math.exp %36 : vector<8x8xf32>
    %cst_20 = arith.constant dense<0.000000e+00> : vector<8xf32>
    %38 = vector.multi_reduction <add>, %37, %cst_20 [1] : vector<8x8xf32> to vector<8xf32>
    %39 = vector.shape_cast %38 : vector<8xf32> to vector<8x1xf32>
    %40 = arith.truncf %37 : vector<8x8xf32> to vector<8x8xbf16>
    %cst_21 = arith.constant dense<0.000000e+00> : vector<8x8xf32>
    %41 = tpu.matmul %40, %31, %cst_21 {dimension_numbers = #tpu.dot_dimension_numbers<[1], [0], [0], [1], [0, 0, 1, 1], [], []>} : vector<8x8xbf16>, vector<8x8xbf16>, vector<8x8xf32> -> vector<8x8xf32>
    %42 = tpu.reciprocal %39 {approx = true} : vector<8x1xf32> -> vector<8x1xf32>
    %43 = vector.broadcast %42 : vector<8x1xf32> to vector<8x8xf32>
    %44 = arith.mulf %41, %43 : vector<8x8xf32>
    %c0_22 = arith.constant 0 : index
    %c8_23 = arith.constant 8 : index
    %45 = vector.load %arg11[%c0_22, %c8_23] : memref<8x32xf32, #tpu.memory_space<vmem>>, vector<8x8xf32>
    tpu.vector_store %arg11[%c0_22, %c8_23], %44 {strides = array<i32>} : memref<8x32xf32, #tpu.memory_space<vmem>>, vector<8x8xf32>,
    %46 = vector.extract_strided_slice %11 {offsets = [0, 16], sizes = [8, 8], strides = [1, 1]} : vector<8x32xbf16> to vector<8x8xbf16>
    %c0_24 = arith.constant 0 : index
    %c16 = arith.constant 16 : index
    %47 = vector.load %arg10[%c0_24, %c16] : memref<8x64xbf16, #tpu.memory_space<vmem>>, vector<8x8xbf16>
    %c0_25 = arith.constant 0 : index
    %c48 = arith.constant 48 : index
    %48 = vector.load %arg10[%c0_25, %c48] : memref<8x64xbf16, #tpu.memory_space<vmem>>, vector<8x8xbf16>
    %cst_26 = arith.constant dense<0.000000e+00> : vector<8x8xf32>
    %49 = tpu.matmul %46, %47, %cst_26 {dimension_numbers = #tpu.dot_dimension_numbers<[1], [1], [0], [0], [0, 0, 1, 0], [], []>} : vector<8x8xbf16>, vector<8x8xbf16>, vector<8x8xf32> -> vector<8x8xf32>
    %cst_27 = arith.constant dense<0xFF800000> : vector<8xf32>
    %50 = vector.multi_reduction <maximumf>, %49, %cst_27 [1] : vector<8x8xf32> to vector<8xf32>
    %51 = vector.shape_cast %50 : vector<8xf32> to vector<8x1xf32>
    %52 = vector.broadcast %51 : vector<8x1xf32> to vector<8x8xf32>
    %53 = arith.subf %49, %52 : vector<8x8xf32>
    %54 = math.exp %53 : vector<8x8xf32>
    %cst_28 = arith.constant dense<0.000000e+00> : vector<8xf32>
    %55 = vector.multi_reduction <add>, %54, %cst_28 [1] : vector<8x8xf32> to vector<8xf32>
    %56 = vector.shape_cast %55 : vector<8xf32> to vector<8x1xf32>
    %57 = arith.truncf %54 : vector<8x8xf32> to vector<8x8xbf16>
    %cst_29 = arith.constant dense<0.000000e+00> : vector<8x8xf32>
    %58 = tpu.matmul %57, %48, %cst_29 {dimension_numbers = #tpu.dot_dimension_numbers<[1], [0], [0], [1], [0, 0, 1, 1], [], []>} : vector<8x8xbf16>, vector<8x8xbf16>, vector<8x8xf32> -> vector<8x8xf32>
    %59 = tpu.reciprocal %56 {approx = true} : vector<8x1xf32> -> vector<8x1xf32>
    %60 = vector.broadcast %59 : vector<8x1xf32> to vector<8x8xf32>
    %61 = arith.mulf %58, %60 : vector<8x8xf32>
    %c0_30 = arith.constant 0 : index
    %c16_31 = arith.constant 16 : index
    %62 = vector.load %arg11[%c0_30, %c16_31] : memref<8x32xf32, #tpu.memory_space<vmem>>, vector<8x8xf32>
    tpu.vector_store %arg11[%c0_30, %c16_31], %61 {strides = array<i32>} : memref<8x32xf32, #tpu.memory_space<vmem>>, vector<8x8xf32>,
    %63 = vector.extract_strided_slice %11 {offsets = [0, 24], sizes = [8, 8], strides = [1, 1]} : vector<8x32xbf16> to vector<8x8xbf16>
    %c0_32 = arith.constant 0 : index
    %c24 = arith.constant 24 : index
    %64 = vector.load %arg10[%c0_32, %c24] : memref<8x64xbf16, #tpu.memory_space<vmem>>, vector<8x8xbf16>
    %c0_33 = arith.constant 0 : index
    %c56 = arith.constant 56 : index
    %65 = vector.load %arg10[%c0_33, %c56] : memref<8x64xbf16, #tpu.memory_space<vmem>>, vector<8x8xbf16>
    %cst_34 = arith.constant dense<0.000000e+00> : vector<8x8xf32>
    %66 = tpu.matmul %63, %64, %cst_34 {dimension_numbers = #tpu.dot_dimension_numbers<[1], [1], [0], [0], [0, 0, 1, 0], [], []>} : vector<8x8xbf16>, vector<8x8xbf16>, vector<8x8xf32> -> vector<8x8xf32>
    %cst_35 = arith.constant dense<0xFF800000> : vector<8xf32>
    %67 = vector.multi_reduction <maximumf>, %66, %cst_35 [1] : vector<8x8xf32> to vector<8xf32>
    %68 = vector.shape_cast %67 : vector<8xf32> to vector<8x1xf32>
    %69 = vector.broadcast %68 : vector<8x1xf32> to vector<8x8xf32>
    %70 = arith.subf %66, %69 : vector<8x8xf32>
    %71 = math.exp %70 : vector<8x8xf32>
    %cst_36 = arith.constant dense<0.000000e+00> : vector<8xf32>
    %72 = vector.multi_reduction <add>, %71, %cst_36 [1] : vector<8x8xf32> to vector<8xf32>
    %73 = vector.shape_cast %72 : vector<8xf32> to vector<8x1xf32>
    %74 = arith.truncf %71 : vector<8x8xf32> to vector<8x8xbf16>
    %cst_37 = arith.constant dense<0.000000e+00> : vector<8x8xf32>
    %75 = tpu.matmul %74, %65, %cst_37 {dimension_numbers = #tpu.dot_dimension_numbers<[1], [0], [0], [1], [0, 0, 1, 1], [], []>} : vector<8x8xbf16>, vector<8x8xbf16>, vector<8x8xf32> -> vector<8x8xf32>
    %76 = tpu.reciprocal %73 {approx = true} : vector<8x1xf32> -> vector<8x1xf32>
    %77 = vector.broadcast %76 : vector<8x1xf32> to vector<8x8xf32>
    %78 = arith.mulf %75, %77 : vector<8x8xf32>
    %c0_38 = arith.constant 0 : index
    %c24_39 = arith.constant 24 : index
    %79 = vector.load %arg11[%c0_38, %c24_39] : memref<8x32xf32, #tpu.memory_space<vmem>>, vector<8x8xf32>
    tpu.vector_store %arg11[%c0_38, %c24_39], %78 {strides = array<i32>} : memref<8x32xf32, #tpu.memory_space<vmem>>, vector<8x8xf32>,
    %c0_40 = arith.constant 0 : index
    %c0_41 = arith.constant 0 : index
    %80 = vector.load %arg11[%c0_40, %c0_41] : memref<8x32xf32, #tpu.memory_space<vmem>>, vector<8x32xf32>
    %81 = arith.truncf %80 : vector<8x32xf32> to vector<8x32xbf16>
    %c0_42 = arith.constant 0 : index
    %c0_43 = arith.constant 0 : index
    %82 = vector.load %arg7[%c0_42, %c0_43] : memref<32x128xbf16, #tpu.memory_space<vmem>>, vector<32x128xbf16>
    %cst_44 = arith.constant dense<0.000000e+00> : vector<8x128xf32>
    %83 = tpu.matmul %81, %82, %cst_44 {dimension_numbers = #tpu.dot_dimension_numbers<[1], [0], [0], [1], [0, 0, 1, 1], [], []>} : vector<8x32xbf16>, vector<32x128xbf16>, vector<8x128xf32> -> vector<8x128xf32>
    %c0_45 = arith.constant 0 : index
    %c0_46 = arith.constant 0 : index
    %84 = vector.load %arg8[%c0_45, %c0_46] : memref<1x128xf32, #tpu.memory_space<vmem>>, vector<1x128xf32>
    %85 = vector.broadcast %84 : vector<1x128xf32> to vector<8x128xf32>
    %86 = arith.addf %83, %85 : vector<8x128xf32>
    %c0_47 = arith.constant 0 : index
    %c0_48 = arith.constant 0 : index
    %c0_49 = arith.constant 0 : index
    %87 = vector.load %arg9[%c0_47, %c0_48, %c0_49] : memref<1x8x128xf32, #tpu.memory_space<vmem>>, vector<1x8x128xf32>
    %88 = vector.shape_cast %87 : vector<1x8x128xf32> to vector<8x128xf32>
    %89 = vector.shape_cast %86 : vector<8x128xf32> to vector<1x8x128xf32>
    tpu.vector_store %arg9[%c0_47, %c0_48, %c0_49], %89 {strides = array<i32>} : memref<1x8x128xf32, #tpu.memory_space<vmem>>, vector<1x8x128xf32>,
    return
  }
  func.func @transform_0(%arg0: i32, %arg1: i32) -> (i32, i32, i32) {
    %c0_i32 = arith.constant 0 : i32
    %c0_i32_0 = arith.constant 0 : i32
    %c0_i32_1 = arith.constant 0 : i32
    return %arg0, %c0_i32, %c0_i32_0 : i32, i32, i32
  }
  func.func @transform_1(%arg0: i32, %arg1: i32) -> (i32, i32) {
    %c0_i32 = arith.constant 0 : i32
    %c0_i32_0 = arith.constant 0 : i32
    %c0_i32_1 = arith.constant 0 : i32
    return %c0_i32, %c0_i32_0 : i32, i32
  }
  func.func @transform_2(%arg0: i32, %arg1: i32) -> (i32, i32) {
    %c0_i32 = arith.constant 0 : i32
    %c0_i32_0 = arith.constant 0 : i32
    %c0_i32_1 = arith.constant 0 : i32
    return %c0_i32, %c0_i32_0 : i32, i32
  }
  func.func @transform_3(%arg0: i32, %arg1: i32) -> (i32, i32) {
    %c0_i32 = arith.constant 0 : i32
    %c0_i32_0 = arith.constant 0 : i32
    %c0_i32_1 = arith.constant 0 : i32
    return %c0_i32, %c0_i32_0 : i32, i32
  }
  func.func @transform_4(%arg0: i32, %arg1: i32) -> (i32, i32) {
    %c0_i32 = arith.constant 0 : i32
    %c0_i32_0 = arith.constant 0 : i32
    %c0_i32_1 = arith.constant 0 : i32
    return %c0_i32, %c0_i32_0 : i32, i32
  }
  func.func @transform_5(%arg0: i32, %arg1: i32) -> (i32, i32) {
    %c0_i32 = arith.constant 0 : i32
    %c0_i32_0 = arith.constant 0 : i32
    %c0_i32_1 = arith.constant 0 : i32
    return %c0_i32, %c0_i32_0 : i32, i32
  }
  func.func @transform_6(%arg0: i32, %arg1: i32) -> (i32, i32) {
    %c0_i32 = arith.constant 0 : i32
    %c0_i32_0 = arith.constant 0 : i32
    %c0_i32_1 = arith.constant 0 : i32
    return %c0_i32, %c0_i32_0 : i32, i32
  }
  func.func @transform_7(%arg0: i32, %arg1: i32) -> (i32, i32, i32) {
    %c0_i32 = arith.constant 0 : i32
    %c0_i32_0 = arith.constant 0 : i32
    return %arg0, %arg1, %c0_i32 : i32, i32, i32
  }
}

</mosaic_0001>

<bundles_post_ra>
// kernel: tpu_custom_call.1
= control target key start
LH: loop header
LB: loop body
LE: loop exit
PB: predicated region body
PF: predicated region fallthrough
CT: control target
= control target key end

     0   :  { %12 = vsyncpa [#allocation5], 0  ;;  %s1974_s0 = inlined_call_operand.hbm [shape: f32[2,8,32], index: 0, kind: input, shape index: {}]   ;;  %s1975_s1 = inlined_call_operand.hbm [shape: bf16[32,32], index: 1, kind: input, shape index: {}]   ;;  %s1976_s2 = inlined_call_operand.vmem [shape: f32[1,32], index: 2, kind: input, shape index: {}]   ;;  %s1977_s3 = inlined_call_operand.hbm [shape: bf16[32,64], index: 3, kind: input, shape index: {}]   ;;  %s1978_s4 = inlined_call_operand.vmem [shape: f32[1,64], index: 4, kind: input, shape index: {}]   ;;  %s1979_s5 = inlined_call_operand.vmem [shape: bf16[32,128], index: 5, kind: input, shape index: {}]   ;;  %s1980_s6 = inlined_call_operand.vmem [shape: f32[1,128], index: 6, kind: input, shape index: {}]   ;;  %s1981_s7 = inlined_call_operand.hbm [shape: f32[2,8,128], index: 7, kind: output, shape index: {}]  }
   0x1   :  { %14 = vsyncpa [#allocation5 + $0x1], 0 }
   0x2   :  { %15 = vsyncpa [#allocation8], 0 }
   0x3   :  { %16 = vsyncpa [#allocation6], 0 }
   0x4   :  { %18 = vsyncpa [#allocation6 + $0x1], 0  ;;  %s1633_s24 = smov 0   ;;  %s1635_s25 = smov 0  }
   0x5   :  { %s1637_s26 = smov 0   ;;  %s1639_s27 = smov 0  }
   0x6   :  { %s1641_s28 = smov 0   ;;  %s1643_s29 = smov 0  }
   0x7 LB: > { %1988 = sst [smem:[#allocation14_spill]] %s1553_s24  ;;  %s1140_s30 = sadd.s32 4294967295, %s1573_s29   ;;  %s1573_s29 = sphi %s1643_s29, %s24_s29   ;;  %s1569_s28 = sphi %s1641_s28, %s2009_s28   ;;  %s1565_s27 = sphi %s1639_s27, %s2008_s27   ;;  %s1561_s26 = sphi %s1637_s26, %s2007_s26   ;;  %s1557_s25 = sphi %s1635_s25, %s2006_s25   ;;  %s1553_s24 = sphi %s1633_s24, %s2005_s24  }
   0x8   : > { %s1141_s8 = sadd.s32 4294967294, %s1573_s29   ;;  %p56_p0 = scmp.ne.s32.totalorder %s1557_s25, %s1553_s24 }
   0x9   : > { %p1667_p1 = scmp.eq.s32.totalorder %s1140_s30, 0  ;;  %p1671_p2 = scmp.eq.s32.totalorder %s1140_s30, 1 }
   0xa   : > { %p214_p3 = scmp.eq.s32.totalorder %s1141_s8, 1  ;;  %p1142_p5 = scmp.ge.s32.totalorder %s1573_s29, 1 }
   0xb   : > { %s1989_s9 = scalar_select %p1667_p1, 1, 0 }
   0xc   : > { %p1677_p4 = por %p1667_p1, %p56_p0  ;;  %p1682_p6 = por %p214_p3, %p56_p0 }
   0xd   : > { %p221_p7 = scmp.lt.s32.totalorder %s1573_s29, 3  ;;  %s1575_s14 = smov [#allocation7]  }
   0xe   : > { %s1991_s11 = scalar_select %p1677_p4, 1, 0 }
   0xf   : > { %s1992_s12 = scalar_select %p1682_p6, 1, 0 }
  0x10   : > { %p1687_p8 = pnand %p1142_p5, %p221_p7  ;;  %s233_s15 = sshll.u32 %s1575_s14, 4  ;;  %s1691_s15 = int_to_ptr.vmem [resolvable:$true] %s233_s15 }
  0x11   : > { %1993 = sst [smem:[#allocation15_spill]] %s1992_s12  ;;  %s1576_s17 = smov [#allocation9]  }
  0x12   : > { %p1290_p9 = pneg %p1687_p8  ;;  %s249_s18 = sshll.u32 %s1576_s17, 4  ;;  %s1702_s18 = int_to_ptr.vmem [resolvable:$true] %s249_s18 }
  0x13   : > { %s1401_s21 = scalar_lea.hbm %s1975_s1, 256 }
  0x14   : > { %p1698_p11 = pnand %p1290_p9, %p1667_p1  ;;  %p1402_p12 = scmp.ne.s32.totalorder %s1975_s1, %s1401_s21 }
  0x15   : > { %p1408_p5 = scmp.lt.u32.totalorder %s1401_s21, %s1975_s1 }
  0x16   : > { %p1403_p13 = pneg %p1698_p11 }
  0x18   : > { %p1404_p0 = pnand %p1403_p13, %p1402_p12 }
  0x1a   : > { %p1405_p3 = pneg %p1404_p0 }
  0x1c   : > { %p1410_p7 = pnand %p1408_p5, %p1405_p3 }
  0x1e   : > { %1413 = shalt.err (!%p1410_p7)
}
  0x1f   : > { %s1414_s14 = scalar_lea.vmem %s1691_s15, 256  ;;  %p1422_p1 = scmp.lt.s32.totalorder %s1691_s15, %s1691_s15 }
  0x20   : > { %p1415_p9 = scmp.ne.s32.totalorder %s1691_s15, %s1414_s14  ;;  %p1423_p12 = scmp.lt.s32.totalorder %s1414_s14, %s1414_s14 }
  0x22   : > { %p1417_p10 = pnand %p1415_p9, %p1403_p13  ;;  %p1424_p0 = por %p1423_p12, %p1422_p1 }
  0x24   : > { %p1418_p6 = pneg %p1417_p10 }
  0x26   : > { %p1425_p4 = pnand %p1424_p0, %p1418_p6 }
  0x28   : > { %1428 = shalt.err (!%p1425_p4)
}
  0x29   : > { %s1577_s17 = smov 64   ;;  %s1578_s19 = smov 4  }
  0x2a   : > { %1293 = dma.hbm_to_vmem [thread:$0]  (!%p1698_p11), %s1975_s1, 256, %s1691_s15, [#allocation8], %s1577_s17, %s1577_s17, %s1578_s19  }
  0x2b   : > { %s1429_s30 = scalar_lea.hbm %s1977_s3, 256 }
  0x2c   : > { %p1430_p1 = scmp.ne.s32.totalorder %s1977_s3, %s1429_s30  ;;  %p1436_p10 = scmp.lt.u32.totalorder %s1429_s30, %s1977_s3 }
  0x2e   : > { %p1432_p4 = pnand %p1430_p1, %p1403_p13 }
  0x30   : > { %p1433_p6 = pneg %p1432_p4 }
  0x32   : > { %p1438_p3 = pnand %p1436_p10, %p1433_p6 }
  0x34   : > { %1441 = shalt.err (!%p1438_p3)
}
  0x35   : > { %s1442_s15 = scalar_lea.vmem %s1702_s18, 256  ;;  %p1450_p12 = scmp.lt.s32.totalorder %s1702_s18, %s1702_s18 }
  0x36   : > { %p1443_p5 = scmp.ne.s32.totalorder %s1702_s18, %s1442_s15  ;;  %p1451_p0 = scmp.lt.s32.totalorder %s1442_s15, %s1442_s15 }
  0x38   : > { %p1445_p7 = pnand %p1443_p5, %p1403_p13  ;;  %p1452_p1 = por %p1451_p0, %p1450_p12 }
  0x3a   : > { %p1446_p9 = pneg %p1445_p7 }
  0x3c   : > { %p1453_p4 = pnand %p1452_p1, %p1446_p9 }
  0x3e   : > { %1456 = shalt.err (!%p1453_p4)
}
  0x3f   : > { %1296 = dma.hbm_to_vmem [thread:$0]  (!%p1698_p11), %s1977_s3, 256, %s1702_s18, [#allocation8], %s1577_s17, %s1577_s17, %s1578_s19  }
  0x40   : > { %s36_s20 = sadd.s32 1, %s1569_s28  ;;  %s43_s21 = sadd.s32 1, %s1561_s26 }
  0x41   : > { %p38_p13 = scmp.ge.s32.totalorder %s36_s20, 2  ;;  %p50_p6 = scmp.ne.s32.totalorder %s1561_s26, %s1557_s25 }
  0x42   : > { %p51_p10 = scmp.eq.s32.totalorder %s1573_s29, 0  ;;  %p1307_p3 = scmp.lt.s32.totalorder %s1573_s29, 2 }
  0x43   : > { %s2011_s20 = smov (%p38_p13, %s36_s20), 0  ;;  %p1766_p7 = por %p1671_p2, %p50_p6 }
  0x44   : > { %p52_p5 = por %p51_p10, %p50_p6  ;;  %s40_s22 = ssub.s32 %s1569_s28, %s2011_s20 }
  0x45   : > { %s1996_s16 = scalar_select %p1766_p7, 1, 0 }
  0x46   : > { %s272_s23 = sand.u32 1, %s1561_s26   ;;  %p41_p9 = scmp.eq.s32.totalorder %s40_s22, 0 }
  0x47   : > { %s1146_s18 = sshll.u32 %s272_s23, 3  ;;  %s1147_s17 = sshll.u32 %s1569_s28, 7 }
  0x48   : > { %s1775_s19 = scalar_select %p41_p9, %s1561_s26, %s43_s21  }
  0x49   : > { %s1780_s14 = scalar_lea.hbm %s1974_s0, %s1147_s17  ;;  %s276_s10 = scalar_lea.vmem [#allocation4], %s1146_s18 }
  0x4a   : > { %s283_s15 = sshll.u32 %s276_s10, 4  ;;  %p1784_p2 = pnand %p1307_p3, %p52_p5  ;;  %s1788_s15 = int_to_ptr.vmem [resolvable:$true] %s283_s15 }
  0x4b   : > { %s273_s12 = scalar_lea.sflag [#allocation5], %s272_s23  ;;  %s1457_s21 = scalar_lea.hbm %s1780_s14, 128 }
  0x4c   : > { %p1458_p11 = scmp.ne.s32.totalorder %s1780_s14, %s1457_s21  ;;  %p1459_p12 = pneg %p1784_p2 }
  0x4d   : > { %s1462_s17 = scalar_lea.hbm %s1974_s0, 256  ;;  %p1463_p4 = scmp.lt.u32.totalorder %s1780_s14, %s1974_s0 }
  0x4e   : > { %p1460_p0 = pnand %p1459_p12, %p1458_p11  ;;  %p1464_p13 = scmp.lt.u32.totalorder %s1462_s17, %s1457_s21 }
  0x4f   : > { %p1466_p10 = scmp.lt.u32.totalorder %s1457_s21, %s1780_s14 }
  0x50   : > { %p1461_p1 = pneg %p1460_p0  ;;  %p1465_p6 = por %p1464_p13, %p1463_p4 }
  0x52   : > { %p1467_p3 = por %p1466_p10, %p1465_p6 }
  0x54   : > { %p1468_p5 = pnand %p1467_p3, %p1461_p1 }
  0x56   : > { %1471 = shalt.err (!%p1468_p5)
}
  0x57   : > { %s1472_s23 = scalar_lea.vmem %s1788_s15, 128  ;;  %s1579_s10 = smov [#allocation4]  }
  0x58   : > { %p1473_p9 = scmp.ne.s32.totalorder %s1788_s15, %s1472_s23  ;;  %s1477_s22 = sshll.u32 %s1579_s10, 4  ;;  %s1478_s22 = int_to_ptr.vmem [resolvable:$false] %s1477_s22 }
  0x59   : > { %s1479_s18 = scalar_lea.vmem %s1478_s22, 256  ;;  %p1480_p7 = scmp.lt.s32.totalorder %s1788_s15, %s1478_s22 }
  0x5a   : > { %p1475_p11 = pnand %p1473_p9, %p1459_p12  ;;  %p1481_p4 = scmp.lt.s32.totalorder %s1479_s18, %s1472_s23 }
  0x5c   : > { %p1476_p0 = pneg %p1475_p11  ;;  %p1482_p13 = por %p1481_p4, %p1480_p7 }
  0x5e   : > { %p1483_p6 = pnand %p1482_p13, %p1476_p0 }
  0x60   : > { %1486 = shalt.err (!%p1483_p6)
}
  0x61   : > { %1300 = dma.hbm_to_vmem [thread:$0]  (!%p1784_p2), %s1780_s14, 128, %s1788_s15, %s273_s12  }
  0x62   : > { %292 = sbr.rel (%p1687_p8) target bundleno = 1430 (0x596), region = 48  ;;  %s1818_s21 = sand.u32 (!%p1687_p8), 1, %s1557_s25  }
  0x63   : > { %s1149_s17 = sshll.u32 (!%p1687_p8), %s1818_s21, 3  ;;  %s295_s30 = scalar_lea.sflag (!%p1687_p8), [#allocation5], %s1818_s21 }
  0x64   : > { %s298_s8 = scalar_lea.vmem (!%p1687_p8), [#allocation4], %s1149_s17  ;;  %p1998_p7 = scmp.ne.s32.totalorder (!%p1687_p8), %s1991_s11, 0 }
  0x69   : > { %1540 = dma.done.wait (%p1998_p7), %s295_s30, 128  }
  0x6a   : > { %1542 = vsyncadd (%p1998_p7), %s295_s30, 4294967168  ;;  %p1999_p2 = scmp.ne.s32.totalorder %s1989_s9, 0 }
  0x6c   : > { %1544 = dma.done.wait (%p1999_p2), [#allocation8], 512  }
  0x6d   : > { %1546 = vsyncadd (%p1999_p2), [#allocation8], 4294966784  ;;  %v1580_v0 = vmov 0.0   ;;  %vm1581_vm0 = vmmov 0   ;;  %v1375_v1 = vld [vmem:[#allocation9] sm:$0xff]   ;;  %v1376_v2 = vld [vmem:[#allocation9 + $0x8] sm:$0xff]  }
  0x6e   : > { %1206 = vmatprep.subr.bf16.mxu0 %v1580_v0  ;;  %1210 = vmatprep.mubr.msk.bf16.mxu0 %vm1581_vm0, %v1580_v0  ;;  %v342_v3 = vld [vmem:[%s298_s8] sm:$0xff]  ;;  %v1377_v4 = vld [vmem:[#allocation7] sm:$0xff]   ;;  %v1378_v5 = vld [vmem:[#allocation7 + $0x8] sm:$0xff]   ;;  %vm367_vm1 = vcmask 261120   ;;  %vm412_vm2 = vcmask 519168   ;;  %vm485_vm3 = vcmask 64512  }
  0x6f   : > { %1214 = vmatprep.subr.bf16.mxu1 %v1580_v0  ;;  %1218 = vmatprep.mubr.msk.bf16.mxu1 %vm1581_vm0, %v1580_v0  ;;  %v343_v6 = vpack.c.bf16 %v342_v3, %v342_v3  ;;  %v1153_v7 = vld [vmem:[%s1978_s4] ss:$0 sm:$0xff]  ;;  %s1582_s15 = smov 112   ;;  %s1583_s24 = smov 120   ;;  %vm550_vm4 = vcmask 1043456   ;;  %vm716_vm5 = vcmask 130112  }
  0x70   : > { %1207 = vmatpush3.bf16.msra.mxu0 %v1375_v1  ;;  %1215 = vmatpush3.bf16.msra.mxu1 %v1377_v4  ;;  %v1157_v18 = vld [vmem:[%s1976_s2] ss:$0 sm:$0xff]  ;;  %s1584_s12 = smov 104   ;;  %s1585_s23 = smov 96   ;;  %vm836_vm6 = vcmask 195712   ;;  %vm956_vm7 = vcmask 261312  }
  0x71   : > { %1208 = vmatprep.subr.bf16.mxu0 %v1580_v0  ;;  %1216 = vmatprep.subr.bf16.mxu1 %v1580_v0  ;;  %s1586_s10 = smov 80   ;;  %s1587_s22 = smov 72  }
  0x72   : > { %s1588_s18 = smov 88   ;;  %s1589_s30 = smov 8  }
  0x73   : > { %s1590_s14 = smov 16   ;;  %p2000_p12 = scmp.ne.s32.totalorder %s1996_s16, 0 }
  0x74   : > { %1209 = vmatpush3.bf16.msra.mxu0 %v1376_v2  ;;  %1217 = vmatpush3.bf16.msra.mxu1 %v1378_v5 }
  0x75   : > { %1222 = vmatprep.subr.bf16.mxu0 %v1580_v0  ;;  %1228 = vmatprep.subr.bf16.mxu1 %v1580_v0 }
  0x77   : > { %1211 = vmatmul.mubr.msk.bf16.vlgmr.msra.gmra.mrb[0].mxu0 %vm367_vm1, %v343_v6  ;;  %1219 = vmatmul.mubr.msk.bf16.vlgmr.msra.gmra.mrb[0].mxu1 %vm367_vm1, %v343_v6 }
  0x78   : > { %1224 = vmatprep.mubr.msk.bf16.mxu0 %vm1581_vm0, %v1580_v0  ;;  %1230 = vmatprep.mubr.msk.bf16.mxu1 %vm1581_vm0, %v1580_v0 }
 0x14a   : > { %v405_v8 = vpop.f32.mrb[0].mxu0  ;;  %v477_v14 = vpop.f32.mrb[0].mxu1 }
 0x14b   : > { %v406_v9 = vadd.f32 %v1153_v7, %v405_v8  ;;  %v1212_v10 = vpop.f32.mrb[1].mxu0  ;;  %v1220_v15 = vpop.f32.mrb[1].mxu1  ;;  %v478_v19 = vadd.f32 %v1157_v18, %v477_v14 }
 0x14c   : > { %v408_v11 = vpop.f32.mrb[2].mxu0  ;;  %v480_v16 = vpop.f32.mrb[2].mxu1 }
 0x14d   : > { %v411_v12 = vpack.c.bf16 %v406_v9, %v406_v9  ;;  %v1213_v13 = vpop.f32.mrb[3].mxu0  ;;  %v1221_v17 = vpop.f32.mrb[3].mxu1  ;;  %v483_v24 = vpack.c.bf16 %v478_v19, %v478_v19 }
 0x14f   : > { %413 = vst.msk [vmem:[#allocation2] sm:$0xf] %vm412_vm2, %v411_v12 }
 0x156   : > { %v484_v20 = vld [vmem:[#allocation2] sm:$0xf] }
 0x157   : > { %v1854_v21 = vld [vmem:[#allocation2] ss:$0 sps:$4 sm:$0xff]   ;;  %v490_v22 = vsel %vm485_vm3, %v484_v20, 0  ;;  %v1162_v26 = vcombine.low %v484_v20, %v484_v20 }
 0x158   : > { %v1857_v23 = vld [vmem:[#allocation2] ss:$0 sps:$4 sm:$0xff]   ;;  %1223 = vmatpush3.bf16.xpose.msra.mxu0 %v490_v22  ;;  %724 = vrot.lane.b32.xlu1 %v1854_v21, %s1582_s15 }
 0x159   : > { %604 = vrot.lane.b32.xlu0 %v1857_v23, %s1583_s24  ;;  %1234 = vmatprep.subr.bf16.mxu0 %v1580_v0  ;;  %v1381_v25 = vld [vmem:[#allocation2] ss:$0 sps:$4 sm:$0xff]  }
 0x15c   : > { %719 = vrot.lane.b32.xlu1 %v483_v24, %s1582_s15  ;;  %s1591_s15 = smov 24  }
 0x15d   : > { %599 = vrot.lane.b32.xlu0 %v483_v24, %s1583_s24 }
 0x15f   : > { %1225 = vmatmul.mubr.msk.bf16.vlgmr.msra.gmra.mrb[4].mxu0 %vm485_vm3, %v483_v24 }
 0x160   : > { %839 = vrot.lane.b32.xlu1 %v483_v24, %s1584_s12  ;;  %1236 = vmatprep.mubr.msk.bf16.mxu0 %vm1581_vm0, %v1580_v0 }
 0x161   : > { %844 = vrot.lane.b32.xlu0 %v1381_v25, %s1584_s12 }
 0x164   : > { %545 = vrot.lane.b32.xlu1 %v1162_v26, %s1585_s23  ;;  %s1178_s23 = sshll.u32 %s1565_s27, 7  ;;  %s1028_s27 = scalar_lea.sflag [#allocation6], %s1818_s21 }
 0x165   : > { %s1925_s8 = scalar_lea.hbm %s1981_s7, %s1178_s23 }
 0x1ca   : > { %v725_v27 = vpop.permute.xlu1 %724 }
 0x1cb   : > { %v605_v28 = vpop.permute.xlu0 %604  ;;  %v730_v33 = vsel %vm485_vm3, %v725_v27, 0 }
 0x1cc   : > { %v610_v29 = vsel %vm485_vm3, %v605_v28, 0 }
 0x1cd   : > { %1235 = vmatpush3.bf16.xpose.msra.mxu0 %v610_v29 }
 0x1ce   : > { %v720_v30 = vpop.permute.xlu1 %719  ;;  %1246 = vmatprep.subr.bf16.mxu0 %v1580_v0 }
 0x1cf   : > { %v600_v32 = vpop.permute.xlu0 %599 }
 0x1d2   : > { %v840_v31 = vpop.permute.xlu1 %839 }
 0x1d3   : > { %v845_v36 = vpop.permute.xlu0 %844 }
 0x1d4   : > { %1237 = vmatmul.mubr.msk.bf16.vlgmr.msra.gmra.mrb[8].mxu0 %vm485_vm3, %v600_v32  ;;  %v850_v37 = vsel %vm485_vm3, %v845_v36, 0 }
 0x1d5   : > { %1247 = vmatpush3.bf16.xpose.msra.mxu0 %v730_v33  ;;  %1248 = vmatprep.mubr.msk.bf16.mxu0 %vm1581_vm0, %v1580_v0 }
 0x1d6   : > { %v546_v34 = vpop.permute.xlu1 %545  ;;  %1258 = vmatprep.subr.bf16.mxu0 %v1580_v0 }
 0x1d7   : > { %v552_v35 = vsel %vm550_vm4, %v546_v34, 0 }
 0x1d8   : > { %1229 = vmatpush3.bf16.msra.mxu1 %v552_v35 }
 0x1d9   : > { %1240 = vmatprep.subr.bf16.mxu1 %v1580_v0 }
 0x1dc   : > { %1249 = vmatmul.mubr.msk.bf16.vlgmr.msra.gmra.mrb[12].mxu0 %vm485_vm3, %v720_v30 }
 0x1dd   : > { %1259 = vmatpush3.bf16.xpose.msra.mxu0 %v850_v37  ;;  %1260 = vmatprep.mubr.msk.bf16.mxu0 %vm1581_vm0, %v1580_v0 }
 0x1de   : > { %1270 = vmatprep.subr.bf16.mxu0 %v1580_v0 }
 0x1e4   : > { %1261 = vmatmul.mubr.msk.bf16.vlgmr.msra.gmra.mrb[16].mxu0 %vm485_vm3, %v840_v31 }
 0x1e5   : > { %1274 = vmatprep.mubr.msk.bf16.mxu0 %vm1581_vm0, %v1580_v0 }
 0x232   : > { %v526_v38 = vpop.f32.mrb[4].mxu0 }
 0x233   : > { %v1226_v39 = vpop.f32.mrb[5].mxu0  ;;  %v532_v40 = vsel %vm485_vm3, %v526_v38, -inf }
 0x234   : > { %533 = vmax.xlane.f32.xlu0 %v532_v40  ;;  %v529_v41 = vpop.f32.mrb[6].mxu0 }
 0x235   : > { %v1227_v42 = vpop.f32.mrb[7].mxu0  ;;  %v1383_v41 = vld [vmem:[%s1979_s5] sm:$0xff]  }
 0x236   : > { %1271 = vmatpush3.bf16.msra.mxu0 %v1383_v41 }
 0x237   : > { %1272 = vmatprep.subr.bf16.mxu0 %v1580_v0 }
 0x2a7   : > { %v646_v43 = vpop.f32.mrb[8].mxu0 }
 0x2a8   : > { %v1238_v44 = vpop.f32.mrb[9].mxu0  ;;  %v652_v45 = vsel %vm485_vm3, %v646_v43, -inf }
 0x2a9   : > { %653 = vmax.xlane.f32.xlu1 %v652_v45  ;;  %v649_v46 = vpop.f32.mrb[10].mxu0  ;;  %v1384_v44 = vld [vmem:[%s1979_s5 + $0x8] sm:$0xff]  }
 0x2aa   : > { %v1239_v47 = vpop.f32.mrb[11].mxu0  ;;  %1273 = vmatpush3.bf16.msra.mxu0 %v1384_v44 }
 0x2af   : > { %v766_v48 = vpop.f32.mrb[12].mxu0 }
 0x2b0   : > { %v1250_v49 = vpop.f32.mrb[13].mxu0  ;;  %v772_v50 = vsel %vm485_vm3, %v766_v48, -inf }
 0x2b1   : > { %773 = vmax.xlane.f32.xlu0 %v772_v50  ;;  %v769_v51 = vpop.f32.mrb[14].mxu0 }
 0x2b2   : > { %v1251_v52 = vpop.f32.mrb[15].mxu0 }
 0x2b7   : > { %v886_v53 = vpop.f32.mrb[16].mxu0 }
 0x2b8   : > { %v1262_v54 = vpop.f32.mrb[17].mxu0  ;;  %v892_v55 = vsel %vm485_vm3, %v886_v53, -inf }
 0x2b9   : > { %893 = vmax.xlane.f32.xlu0 %v892_v55  ;;  %v889_v56 = vpop.f32.mrb[18].mxu0 }
 0x2ba   : > { %782 = vrot.lane.b32.xlu1 %v1854_v21, %s1586_s10  ;;  %v1263_v57 = vpop.f32.mrb[19].mxu0  ;;  %s336_s10 = scalar_lea.vmem [#allocation10], %s1149_s17  ;;  %s1592_s17 = smov [#allocation10]  }
 0x2bb   : > { %s1491_s11 = sshll.u32 %s1592_s17, 4  ;;  %s1492_s11 = int_to_ptr.vmem [resolvable:$false] %s1491_s11 }
 0x2bc   : > { %s1493_s13 = scalar_lea.vmem %s1492_s11, 256 }
 0x2be   : > { %902 = vrot.lane.b32.xlu1 %v1381_v25, %s1587_s22  ;;  %s1042_s22 = sshll.u32 %s336_s10, 4  ;;  %s1927_s22 = int_to_ptr.vmem [resolvable:$true] %s1042_s22 }
 0x2bf   : > { %s1487_s9 = scalar_lea.vmem %s1927_s22, 128  ;;  %p1494_p3 = scmp.lt.s32.totalorder %s1927_s22, %s1492_s11 }
 0x2c0   : > { %p1488_p8 = scmp.ne.s32.totalorder %s1927_s22, %s1487_s9  ;;  %p1495_p5 = scmp.lt.s32.totalorder %s1493_s13, %s1487_s9 }
 0x2c1   : > { %v534_v58 = vpop.xlane.xlu0 %533 }
 0x2c2   : > { %v535_v59 = vsub.f32 %v526_v38, %v534_v58  ;;  %p1489_p1 = pnand %p1488_p8, %p2000_p12  ;;  %p1496_p9 = por %p1495_p5, %p1494_p3 }
 0x2c4   : > { %v536_v60 = vmul.f32 1.442695, %v535_v59  ;;  %v1173_v59 = vld [vmem:[%s1980_s6] ss:$0 sm:$0xff]  ;;  %p1490_p10 = pneg %p1489_p1 }
 0x2c6   : > { %1385 = vpow2.f32 %v536_v60  ;;  %p1497_p11 = pnand %p1496_p9, %p1490_p10 }
 0x2cf   : > { %662 = vrot.lane.b32.xlu0 %v1857_v23, %s1588_s18 }
 0x2d0   : > { %v1386_v61 = vpop.eup %1385 }
 0x2d1   : > { %v541_v62 = vpack.c.bf16 %v1386_v61, %v1386_v61  ;;  %v538_v23 = vsel %vm485_vm3, %v1386_v61, 0.0 }
 0x2d3   : > { %1231 = vmatmul.mubr.msk.bf16.vlgmr.msra.gmra.mrb[4].mxu1 %vm485_vm3, %v541_v62 }
 0x2d4   : > { %1242 = vmatprep.mubr.msk.bf16.mxu1 %vm1581_vm0, %v1580_v0 }
 0x336   : > { %v654_v63 = vpop.xlane.xlu1 %653 }
 0x337   : > { %v655_v1 = vsub.f32 %v646_v43, %v654_v63 }
 0x339   : > { %v656_v2 = vmul.f32 1.442695, %v655_v1 }
 0x33a   : > { %v783_v13 = vpop.permute.xlu1 %782 }
 0x33b   : > { %1387 = vpow2.f32 %v656_v2  ;;  %v788_v17 = vsel %vm550_vm4, %v783_v13, 0 }
 0x33e   : > { %v774_v3 = vpop.xlane.xlu0 %773  ;;  %v903_v18 = vpop.permute.xlu1 %902 }
 0x33f   : > { %v775_v4 = vsub.f32 %v766_v48, %v774_v3  ;;  %v908_v22 = vsel %vm550_vm4, %v903_v18, 0 }
 0x341   : > { %v776_v5 = vmul.f32 1.442695, %v775_v4 }
 0x343   : > { %1389 = vpow2.f32 %v776_v5 }
 0x345   : > { %v1388_v6 = vpop.eup %1387 }
 0x346   : > { %v894_v7 = vpop.xlane.xlu0 %893  ;;  %v658_v8 = vsel %vm485_vm3, %v1388_v6, 0.0  ;;  %v661_v15 = vpack.c.bf16 %v1388_v6, %v1388_v6 }
 0x347   : > { %v895_v9 = vsub.f32 %v886_v53, %v894_v7  ;;  %659 = vadd.xlane.f32.xlu0 %v658_v8 }
 0x349   : > { %v896_v10 = vmul.f32 1.442695, %v895_v9 }
 0x34a   : > { %v663_v11 = vpop.permute.xlu0 %662 }
 0x34b   : > { %1391 = vpow2.f32 %v896_v10  ;;  %v668_v12 = vsel %vm550_vm4, %v663_v11, 0 }
 0x34c   : > { %1241 = vmatpush3.bf16.msra.mxu1 %v668_v12 }
 0x34d   : > { %v1390_v14 = vpop.eup %1389  ;;  %1252 = vmatprep.subr.bf16.mxu1 %v1580_v0 }
 0x34e   : > { %v778_v16 = vsel %vm485_vm3, %v1390_v14, 0.0  ;;  %v781_v20 = vpack.c.bf16 %v1390_v14, %v1390_v14 }
 0x34f   : > { %779 = vadd.xlane.f32.xlu1 %v778_v16  ;;  %1243 = vmatmul.mubr.msk.bf16.vlgmr.msra.gmra.mrb[8].mxu1 %vm485_vm3, %v661_v15 }
 0x350   : > { %1253 = vmatpush3.bf16.msra.mxu1 %v788_v17  ;;  %1254 = vmatprep.mubr.msk.bf16.mxu1 %vm1581_vm0, %v1580_v0 }
 0x351   : > { %1264 = vmatprep.subr.bf16.mxu1 %v1580_v0 }
 0x355   : > { %v1392_v19 = vpop.eup %1391 }
 0x356   : > { %v898_v21 = vsel %vm485_vm3, %v1392_v19, 0.0  ;;  %v901_v24 = vpack.c.bf16 %v1392_v19, %v1392_v19 }
 0x357   : > { %899 = vadd.xlane.f32.xlu0 %v898_v21  ;;  %1255 = vmatmul.mubr.msk.bf16.vlgmr.msra.gmra.mrb[12].mxu1 %vm485_vm3, %v781_v20 }
 0x358   : > { %1265 = vmatpush3.bf16.msra.mxu1 %v908_v22  ;;  %1266 = vmatprep.mubr.msk.bf16.mxu1 %vm1581_vm0, %v1580_v0 }
 0x35b   : > { %539 = vadd.xlane.f32.xlu0 %v538_v23 }
 0x35f   : > { %1267 = vmatmul.mubr.msk.bf16.vlgmr.msra.gmra.mrb[16].mxu1 %vm485_vm3, %v901_v24 }
 0x3a6   : > { %v588_v25 = vpop.f32.mrb[4].mxu1 }
 0x3a7   : > { %v1232_v26 = vpop.f32.mrb[5].mxu1 }
 0x3a8   : > { %v591_v27 = vpop.f32.mrb[6].mxu1 }
 0x3a9   : > { %v1233_v28 = vpop.f32.mrb[7].mxu1 }
 0x3d4   : > { %v660_v29 = vpop.xlane.xlu0 %659 }
 0x3dc   : > { %v780_v34 = vpop.xlane.xlu1 %779 }
 0x3e4   : > { %v900_v30 = vpop.xlane.xlu0 %899 }
 0x3e8   : > { %v540_v31 = vpop.xlane.xlu0 %539 }
 0x3e9   : > { %1393 = vrcp.f32 %v540_v31 }
 0x3ea   : > { %1395 = vrcp.f32 %v660_v29 }
 0x3eb   : > { %1397 = vrcp.f32 %v780_v34 }
 0x3ec   : > { %1399 = vrcp.f32 %v900_v30 }
 0x3f3   : > { %v1394_v32 = vpop.eup %1393 }
 0x3f4   : > { %v595_v33 = vmul.f32 %v1394_v32, %v588_v25  ;;  %v1396_v35 = vpop.eup %1395 }
 0x3f5   : > { %v1398_v42 = vpop.eup %1397 }
 0x3f6   : > { %596 = vst.msk [vmem:[#allocation3] sm:$0xff] %vm485_vm3, %v595_v33  ;;  %v1400_v49 = vpop.eup %1399 }
 0x422   : > { %v704_v36 = vpop.f32.mrb[8].mxu1 }
 0x423   : > { %v711_v37 = vmul.f32 %v1396_v35, %v704_v36  ;;  %v1244_v38 = vpop.f32.mrb[9].mxu1 }
 0x424   : > { %v707_v39 = vpop.f32.mrb[10].mxu1 }
 0x425   : > { %v1245_v40 = vpop.f32.mrb[11].mxu1  ;;  %713 = vrot.lane.b32.xlu1 %v711_v37, %s1589_s30 }
 0x42a   : > { %v824_v43 = vpop.f32.mrb[12].mxu1 }
 0x42b   : > { %v831_v45 = vmul.f32 %v1398_v42, %v824_v43  ;;  %v1256_v46 = vpop.f32.mrb[13].mxu1 }
 0x42c   : > { %v827_v47 = vpop.f32.mrb[14].mxu1 }
 0x42d   : > { %833 = vrot.lane.b32.xlu0 %v831_v45, %s1590_s14  ;;  %v1257_v48 = vpop.f32.mrb[15].mxu1 }
 0x432   : > { %v944_v50 = vpop.f32.mrb[16].mxu1 }
 0x433   : > { %v951_v51 = vmul.f32 %v1400_v49, %v944_v50  ;;  %v1268_v52 = vpop.f32.mrb[17].mxu1 }
 0x434   : > { %v947_v53 = vpop.f32.mrb[18].mxu1 }
 0x435   : > { %v1269_v54 = vpop.f32.mrb[19].mxu1  ;;  %953 = vrot.lane.b32.xlu1 %v951_v51, %s1591_s15 }
 0x497   : > { %v714_v55 = vpop.permute.xlu1 %713 }
 0x498   : > { %717 = vst.msk [vmem:[#allocation3] sm:$0xff] %vm716_vm5, %v714_v55 }
 0x49f   : > { %v834_v0 = vpop.permute.xlu0 %833 }
 0x4a0   : > { %837 = vst.msk [vmem:[#allocation3] sm:$0xff] %vm836_vm6, %v834_v0 }
 0x4a7   : > { %v954_v56 = vpop.permute.xlu1 %953 }
 0x4a8   : > { %957 = vst.msk [vmem:[#allocation3] sm:$0xff] %vm956_vm7, %v954_v56 }
 0x4af   : > { %v958_v57 = vld [vmem:[#allocation3] sm:$0xff] }
 0x4b0   : > { %v959_v58 = vpack.c.bf16 %v958_v57, %v958_v57 }
 0x4b2   : > { %1275 = vmatmul.mubr.msk.bf16.vlgmr.msra.gmra.mrb[20].mxu0 %vm367_vm1, %v959_v58 }
 0x585   : > { %v1020_v60 = vpop.f32.mrb[20].mxu0 }
 0x586   : > { %v1021_v61 = vadd.f32 %v1173_v59, %v1020_v60  ;;  %v1276_v62 = vpop.f32.mrb[21].mxu0 }
 0x587   : > { %v1023_v63 = vpop.f32.mrb[22].mxu0 }
 0x588   : > { %1026 = vst [vmem:[%s336_s10] sm:$0xff] %v1021_v61  ;;  %v1277_v1 = vpop.f32.mrb[23].mxu0 }
 0x589   : > { %1500 = shalt.err (!%p1497_p11)
}
 0x58a   : > { %s1501_s21 = scalar_lea.hbm %s1925_s8, 128  ;;  %s1505_s24 = scalar_lea.hbm %s1981_s7, 256 }
 0x58b   : > { %p1502_p0 = scmp.ne.s32.totalorder %s1925_s8, %s1501_s21  ;;  %p1506_p6 = scmp.lt.u32.totalorder %s1925_s8, %s1981_s7 }
 0x58c   : > { %p1507_p7 = scmp.lt.u32.totalorder %s1505_s24, %s1501_s21  ;;  %p1509_p8 = scmp.lt.u32.totalorder %s1501_s21, %s1925_s8 }
 0x58d   : > { %p1503_p4 = pnand %p1502_p0, %p2000_p12 }
 0x58e   : > { %p1508_p2 = por %p1507_p7, %p1506_p6 }
 0x58f   : > { %p1504_p13 = pneg %p1503_p4 }
 0x590   : > { %p1510_p1 = por %p1509_p8, %p1508_p2 }
 0x592   : > { %p1511_p10 = pnand %p1510_p1, %p1504_p13 }
 0x594   : > { %1514 = shalt.err (!%p1511_p10)
}
 0x595   : > { %1288 = dma.vmem_to_hbm [thread:$0]  (%p2000_p12), %s1927_s22, 128, %s1925_s8, %s1028_s27  }
 0x596 PF: > { %s2001_s10 = sld [smem:[#allocation14_spill]]  ;;  %s2002_s18 = sld [smem:[#allocation15_spill]] }
 0x597   : > { %p2004_p5 = scmp.ge.s32.totalorder %s1573_s29, 2 }
 0x59c   : > { %s1054_s30 = sand.u32 1, %s2001_s10   ;;  %p2003_p3 = scmp.ne.s32.totalorder %s2002_s18, 0 }
 0x59d   : > { %s1055_s9 = scalar_lea.sflag [#allocation6], %s1054_s30 }
 0x59e   : > { %p1302_p9 = pnand %p2004_p5, %p2003_p3 }
 0x5a0   : > { %1548 = dma.done.wait (!%p1302_p9), %s1055_s9, 128  }
 0x5a1   : > { %1550 = vsyncadd (!%p1302_p9), %s1055_s9, 4294967168  ;;  %s24_s29 = sadd.s32 1, %s1573_s29   ;;  %s2005_s24 = smov %s1557_s25 }
 0x5a2   : > { %p21_p11 = scmp.ge.s32.totalorder %s24_s29, 4   ;;  %s2006_s25 = smov %s1561_s26 }
 0x5a3   : > { %s2007_s26 = smov %s1775_s19  ;;  %s2008_s27 = smov %s1569_s28 }
 0x5a4   : > { %s2009_s28 = smov %s2011_s20  ;;  %23 = sbr.rel (!%p21_p11) target bundleno = 7 (0x7), region = 105 }
 0x5ab   :  { %1060 = vsyncpa [#allocation5], 1 }
 0x5ac   :  { %1062 = vsyncpa [#allocation5 + $0x1], 1 }
 0x5ad   :  { %1063 = vsyncpa [#allocation8], 1 }
 0x5ae   :  { %1064 = vsyncpa [#allocation6], 1 }
 0x5af   :  { %1066 = vsyncpa [#allocation6 + $0x1], 1 }

</bundles_post_ra>
